<compile_context>
chip_gen: v5e
topology: v5e:2x2
jax: 0.10.0
libtpu: 0.0.40
codegen_flags: <defaults>
</compile_context>

<pallas_src>
import functools

import jax
import jax.numpy as jnp
from jax import lax
from jax.experimental import pallas as pl
from jax.experimental.pallas import tpu as pltpu

IGNORE_INDEX = -100

_VMEM = pl.BlockSpec(memory_space=pltpu.MemorySpace.VMEM)
_SMEM = pl.BlockSpec(memory_space=pltpu.MemorySpace.SMEM)


# ----------------------------- Pallas kernels ------------------------------

def _sim_itc_kernel(img_ref, txt_ref, temp_ref, i2t_ref, t2i_ref, itc_ref, *,
                    bsz, num_query, eps, rank):
    """Image-text similarity (+ fused ITC loss).

    img_ref: [B*Q, D] image query features, txt_ref: [B, D] text features.
    Outputs sim_i2t [B,B], sim_t2i [B,B], and the label-smoothed ITC loss (1,1).
    """
    img = img_ref[...].astype(jnp.float32)            # [B*Q, D]
    txt = txt_ref[...].astype(jnp.float32)            # [B, D]
    inv_t = 1.0 / temp_ref[0, 0]

    # Single MXU push: contract on D -> [B*Q, B]; then max over the Q query tokens.
    s = lax.dot_general(img, txt, (((1,), (1,)), ((), ())),
                        preferred_element_type=jnp.float32)         # [B*Q, B]
    raw = jnp.max(s.reshape(bsz, num_query, bsz), axis=1)           # raw[b, j] = max_q img[b,q]·txt[j]
    i2t = raw * inv_t
    t2i = raw.T * inv_t           # single-device all_gather identity => t2i[b,j] = raw[j,b]
    i2t_ref[...] = i2t
    t2i_ref[...] = t2i

    def ce_rows(logits):
        # label-smoothed CE, targets = arange(B) + rank * B, no materialized one-hot.
        n = logits.shape[-1]
        m = jnp.max(logits, axis=-1, keepdims=True)
        z = logits - m
        lse = jnp.log(jnp.sum(jnp.exp(z), axis=-1, keepdims=True))
        col = lax.broadcasted_iota(jnp.int32, logits.shape, 1)
        row = lax.broadcasted_iota(jnp.int32, logits.shape, 0)
        tgt_z = jnp.sum(jnp.where(col == row + rank * bsz, z, 0.0), axis=-1, keepdims=True)
        nll = lse - tgt_z                                          # -log p[target]
        smooth = (n * lse - jnp.sum(z, axis=-1, keepdims=True)) / n  # mean_j(-log p[j])
        per = (1.0 - eps) * nll + eps * smooth                     # [B, 1]
        return jnp.sum(per, axis=0, keepdims=True) / bsz           # [1, 1]

    itc_ref[...] = 0.5 * (ce_rows(i2t) + ce_rows(t2i))


def _itg_kernel(logits_ref, labels_ref, loss_ref, cnt_ref,
                m_scr, l_scr, s_scr, t_scr, *,
                eps, vocab, n_tok, tile_rows, v_chunk):
    """Label-smoothed cross entropy (image captioning loss), online over vocab chunks.

    Grid = (row_tiles [parallel], vocab_chunks [arbitrary, innermost]).
    logits_ref: [tile_rows, v_chunk] block (original dtype, upcast here);
    labels_ref: [tile_rows, 1] int32 (-100 = ignore).
    loss_ref / cnt_ref: (1,1,1) per-row-tile partial outputs (written at the last vocab chunk).
    m/l/s/t scratch: running max / sum-exp / sum-logits / target-logit, shape [tile_rows, 1].
    """
    i = pl.program_id(0)          # row-tile index
    j = pl.program_id(1)          # vocab-chunk index
    nj = pl.num_programs(1)

    @pl.when(j == 0)
    def _():
        m_scr[...] = jnp.full_like(m_scr, -jnp.inf)
        l_scr[...] = jnp.zeros_like(l_scr)
        s_scr[...] = jnp.zeros_like(s_scr)
        t_scr[...] = jnp.zeros_like(t_scr)

    chunk = logits_ref[...].astype(jnp.float32)                    # [T, Vc]
    labels = labels_ref[...]                                       # [T, 1] int32
    t, vc = chunk.shape

    col = j * v_chunk + lax.broadcasted_iota(jnp.int32, (t, vc), 1)  # global vocab index
    col_valid = col < vocab

    # Online softmax carry. Only (x - m_new) feeds exp(); target / smoothing sums are
    # taken on the raw upcast logits (no second live [T,V] temporary).
    x = jnp.where(col_valid, chunk, -jnp.inf)                      # SELECT kills garbage cols
    chunk_max = jnp.max(x, axis=-1, keepdims=True)                 # [T, 1]
    m_prev = m_scr[...]
    m_new = jnp.maximum(m_prev, chunk_max)
    l_scr[...] = l_scr[...] * jnp.exp(m_prev - m_new) + \
        jnp.sum(jnp.exp(x - m_new), axis=-1, keepdims=True)
    m_scr[...] = m_new
    s_scr[...] += jnp.sum(jnp.where(col_valid, chunk, 0.0), axis=-1, keepdims=True)
    t_scr[...] += jnp.sum(jnp.where(col == labels, chunk, 0.0), axis=-1, keepdims=True)

    @pl.when(j == nj - 1)
    def _():
        row_g = i * tile_rows + lax.broadcasted_iota(jnp.int32, (t, 1), 0)
        valid = jnp.logical_and(row_g < n_tok, labels != IGNORE_INDEX)    # [T, 1] bool
        lse = m_scr[...] + jnp.log(l_scr[...])                     # log-sum-exp of raw logits
        nll = lse - t_scr[...]                                     # -log p[target]
        smooth = lse - s_scr[...] / vocab                          # mean_j(-log p[j])
        per = (1.0 - eps) * nll + eps * smooth
        per = jnp.where(valid, per, 0.0)     # SELECT: kills NaN/garbage & ignored rows
        vf = jnp.where(valid, 1.0, 0.0)
        loss_ref[...] = jnp.sum(per, axis=0, keepdims=True).reshape(1, 1, 1)
        cnt_ref[...] = jnp.sum(vf, axis=0, keepdims=True).reshape(1, 1, 1)


def _itm_kernel(x_ref, wt_ref, b_ref, out_ref, *, num_rows, local_bsz):
    """ITM head + CE. x_ref: [M, dim_q] (query-token mean already folded — head is linear).

    The 2-class head is computed as two VPU multiply-reduces (no 2-column MXU matmul).
    """
    x = x_ref[...].astype(jnp.float32)                   # [M, dim_q]
    wt = wt_ref[...].astype(jnp.float32)                 # [2, dim_q]  (torch Linear layout)
    b = b_ref[...].astype(jnp.float32)                   # [1, 2]
    z0 = jnp.sum(x * wt[0:1, :], axis=-1, keepdims=True) + b[:, 0:1]   # [M, 1]
    z1 = jnp.sum(x * wt[1:2, :], axis=-1, keepdims=True) + b[:, 1:2]   # [M, 1]
    m = jnp.maximum(z0, z1)
    lse = m + jnp.log(jnp.exp(z0 - m) + jnp.exp(z1 - m))
    row = lax.broadcasted_iota(jnp.int32, (x.shape[0], 1), 0)
    tgt_z = jnp.where(row < local_bsz, z1, z0)            # labels: [1]*B + [0]*2B
    nll = lse - tgt_z                                      # plain CE (no smoothing)
    out_ref[...] = jnp.sum(nll, axis=0, keepdims=True) / num_rows


# ----------------------------- wrappers (glue) ------------------------------

def compute_image_text_similarity(image_features, text_features, temp, *,
                                  label_smoothing=0.1, rank=0):
    """Returns (sim_i2t, sim_t2i, itc_loss_scalar) from one fused Pallas kernel."""
    b, q, d = image_features.shape
    img_flat = image_features.reshape(b * q, d)
    temp_arr = jnp.reshape(jnp.asarray(temp, jnp.float32), (1, 1))
    sim_i2t, sim_t2i, itc = pl.pallas_call(
        functools.partial(_sim_itc_kernel, bsz=b, num_query=q,
                          eps=label_smoothing, rank=rank),
        out_shape=(jax.ShapeDtypeStruct((b, b), jnp.float32),
                   jax.ShapeDtypeStruct((b, b), jnp.float32),
                   jax.ShapeDtypeStruct((1, 1), jnp.float32)),
        in_specs=[_VMEM, _VMEM, _SMEM],
        out_specs=(_VMEM, _VMEM, _VMEM),
        cost_estimate=pl.CostEstimate(
            flops=int(2 * b * q * d * b + 16 * b * b),
            transcendentals=int(2 * b * b),
            bytes_accessed=int(4 * (b * q * d + b * d + 3 * b * b + 1))),
    )(img_flat, text_features, temp_arr)
    return sim_i2t, sim_t2i, itc[0, 0]


def _itg_vmem_budget():
    """Generation-aware VMEM budget (v7x has 64 MiB/TC vs 128 MiB on v5e/v6e)."""
    try:
        cap = int(pltpu.get_tpu_info().vmem_capacity_bytes)
    except Exception:
        cap = 128 * 1024 * 1024
    budget = int(cap * 0.40)        # user tiles (incl. double buffering + f32 temps)
    vmem_limit = int(cap * 0.60)    # scoped limit; leaves headroom for Mosaic scratch
    return budget, vmem_limit


def itg_loss(input_ids, prediction_scores, decoder_bos_token_id, pad_token_id,
             vocab_size, label_smoothing=0.1, downcast_logits_to_bf16=False):
    decoder_input_ids = input_ids.at[:, 0].set(decoder_bos_token_id)
    labels = jnp.where(decoder_input_ids == pad_token_id, IGNORE_INDEX, decoder_input_ids)
    shifted = prediction_scores[:, :-1, :]        # keep original dtype; upcast per-tile in-kernel
    if downcast_logits_to_bf16 and shifted.dtype == jnp.float32:
        # Optional v5e/v6e HBM-bandwidth opt; changes numerics vs the f32 torch reference.
        shifted = shifted.astype(jnp.bfloat16)
    labels = labels[:, 1:]
    b, lm1, v = shifted.shape
    n_tok = b * lm1
    logits2 = shifted.reshape(n_tok, v)
    labels2 = labels.reshape(n_tok, 1).astype(jnp.int32)
    itemsize = jnp.dtype(shifted.dtype).itemsize

    # Vocab chunking: bounds the per-tile footprint independent of vocab size.
    v_chunk = v if v <= 4096 else 2048            # 2048 is a multiple of 128
    n_vchunks = pl.cdiv(v, v_chunk)

    budget, vmem_limit = _itg_vmem_budget()
    # Per-row footprint: double-buffered logits chunk + ~5 f32 working copies per lane + labels.
    bytes_per_row = v_chunk * (2 * itemsize + 20) + 64
    tile_rows = int(max(8, min(1024, (budget // bytes_per_row) // 8 * 8)))
    if tile_rows >= n_tok:
        tile_rows = n_tok                          # full-row block (any size allowed)
    n_row_tiles = pl.cdiv(n_tok, tile_rows)
    grid = (n_row_tiles, n_vchunks)                # rows parallel (megacore), vocab innermost

    loss_part, cnt_part = pl.pallas_call(
        functools.partial(_itg_kernel, eps=label_smoothing, vocab=v,
                          n_tok=n_tok, tile_rows=tile_rows, v_chunk=v_chunk),
        grid=grid,
        out_shape=(jax.ShapeDtypeStruct((n_row_tiles, 1, 1), jnp.float32),
                   jax.ShapeDtypeStruct((n_row_tiles, 1, 1), jnp.float32)),
        in_specs=[pl.BlockSpec((tile_rows, v_chunk), lambda i, j: (i, j)),
                  pl.BlockSpec((tile_rows, 1), lambda i, j: (i, 0))],
        out_specs=(pl.BlockSpec((1, 1, 1), lambda i, j: (i, 0, 0)),
                   pl.BlockSpec((1, 1, 1), lambda i, j: (i, 0, 0))),
        scratch_shapes=[pltpu.VMEM((tile_rows, 1), jnp.float32)] * 4,
        compiler_params=pltpu.CompilerParams(
            dimension_semantics=("parallel", "arbitrary"),
            vmem_limit_bytes=vmem_limit),
        cost_estimate=pl.CostEstimate(
            flops=int(8 * n_tok * v),
            transcendentals=int(n_tok * v),
            bytes_accessed=int(n_tok * v * itemsize + n_tok * 4 + n_row_tiles * 8)),
    )(logits2, labels2)

    total = jnp.sum(loss_part)
    cnt = jnp.sum(cnt_part)
    # NOTE: all-ignored-labels batches return 0.0 here (torch F.cross_entropy returns NaN).
    return total / jnp.maximum(cnt, 1.0)


def itm_loss(input_ids, attention_mask, image_embeds, sim_i2t, sim_t2i,
             model_query_tokens, qformer_fn, itm_head_w, itm_head_b, rng):
    bsz = image_embeds.shape[0]
    # single-device: all_gather is identity, rank = 0
    k1, k2 = jax.random.split(rng)
    w_t2i = jax.nn.softmax(sim_t2i, axis=1) + 1e-4
    w_i2t = jax.nn.softmax(sim_i2t, axis=1) + 1e-4
    diag = jnp.eye(bsz, dtype=w_t2i.dtype)                  # rank 0 local block diagonal
    w_t2i = w_t2i * (1.0 - diag)
    w_i2t = w_i2t * (1.0 - diag)
    # hard-negative sampling (torch.multinomial -> jax.random.categorical), no-grad region
    neg_img_idx = jax.random.categorical(k1, jnp.log(w_t2i), axis=1)
    neg_txt_idx = jax.random.categorical(k2, jnp.log(w_i2t), axis=1)

    image_embeds_neg = image_embeds[neg_img_idx]
    text_ids_neg = input_ids[neg_txt_idx]
    text_atts_neg = attention_mask[neg_txt_idx]

    text_ids_all = jnp.concatenate([input_ids, input_ids, text_ids_neg], axis=0)
    text_atts_all = jnp.concatenate([attention_mask, attention_mask, text_atts_neg], axis=0)
    m_rows = text_ids_all.shape[0]                          # 3 * B
    num_query, dim_q = model_query_tokens.shape[-2], model_query_tokens.shape[-1]
    query_tokens_itm = jnp.broadcast_to(model_query_tokens, (m_rows, num_query, dim_q))
    query_atts_itm = jnp.ones((m_rows, num_query), dtype=attention_mask.dtype)
    attention_mask_all = jnp.concatenate([query_atts_itm, text_atts_all], axis=1)
    image_embeds_all = jnp.concatenate([image_embeds, image_embeds_neg, image_embeds], axis=0)

    vl_embeddings = qformer_fn(text_ids_all, query_tokens_itm, attention_mask_all,
                               image_embeds_all)[:, :num_query, :]      # [M, Q, dim_q]

    # itm_head is linear, so mean over the Q query tokens commutes with the head.
    # Pre-reduce in JAX so the kernel sees only [M, dim_q] (avoids an ungridded
    # [3B, Q, dim_q] VMEM block at production shapes).
    x = jnp.mean(vl_embeddings.astype(jnp.float32), axis=1)             # [M, dim_q]

    out = pl.pallas_call(
        functools.partial(_itm_kernel, num_rows=m_rows, local_bsz=bsz),
        out_shape=jax.ShapeDtypeStruct((1, 1), jnp.float32),
        in_specs=[_VMEM, _VMEM, _VMEM],
        out_specs=_VMEM,
        cost_estimate=pl.CostEstimate(
            flops=int(6 * m_rows * dim_q + 32 * m_rows),
            transcendentals=int(2 * m_rows),
            bytes_accessed=int(4 * (m_rows * dim_q + 2 * dim_q + 2) + 4)),
    )(x, itm_head_w, itm_head_b)
    return out[0, 0]


class Blip2Phase1Loss:
    """JAX/Pallas equivalent of torchmultimodal Blip2Phase1Loss."""

    def __init__(self, dim_q=32, enable_itc=True, enable_itm=True, enable_itg=True,
                 temp=0.07, label_smoothing=0.1, key=None):
        if not enable_itc and not enable_itm and not enable_itg:
            raise ValueError("All the loss tasks are disabled, please set at least one of them.")
        key = jax.random.PRNGKey(42) if key is None else key
        kw, kb = jax.random.split(key)
        self.label_smoothing = label_smoothing
        self.enable_itc = enable_itc
        self.enable_itm = enable_itm
        self.enable_itg = enable_itg
        # nn.Linear(dim_q, 2) — weight kept in torch layout [2, dim_q]; deterministic init
        self.itm_head_w = (0.02 * jax.random.normal(kw, (2, dim_q))).astype(jnp.float32)
        self.itm_head_b = (0.02 * jax.random.normal(kb, (1, 2))).astype(jnp.float32)
        self.temp = jnp.asarray(temp, jnp.float32)

    def __call__(self, model_output, blip2, input_ids, attention_mask, rng):
        sim_i2t, sim_t2i, itc_fused = compute_image_text_similarity(
            model_output["image_features"], model_output["text_features"], self.temp,
            label_smoothing=self.label_smoothing)

        loss_itm = jnp.asarray(0.0, jnp.float32)
        if self.enable_itm:
            loss_itm = itm_loss(input_ids, attention_mask, model_output["image_embeddings"],
                                sim_i2t, sim_t2i, blip2["query_tokens"], blip2["qformer_fn"],
                                self.itm_head_w, self.itm_head_b, rng)

        loss_itg = jnp.asarray(0.0, jnp.float32)
        if self.enable_itg:
            loss_itg = itg_loss(input_ids, model_output["prediction_scores"],
                                blip2["decoder_bos_token_id"], blip2["pad_token_id"],
                                blip2["vocab_size"], self.label_smoothing)

        loss_itc = itc_fused if self.enable_itc else jnp.asarray(0.0, jnp.float32)

        return dict(image_text_contrastive_loss=loss_itc,
                    image_text_matching_loss=loss_itm,
                    image_captioning_loss=loss_itg,
                    total_loss=loss_itc + loss_itm + loss_itg)


def make_standin_qformer(key, vocab_size, vision_dim, dim_q):
    # TODO(synk): the real BLIP2 Q-Former is an external nn.Module injected at forward time;
    # it is not translated — this deterministic stand-in only supplies realistically-shaped
    # query embeddings so the ITM-head Pallas kernel is exercised.
    k1, k2 = jax.random.split(key)
    w_img = 0.05 * jax.random.normal(k1, (vision_dim, dim_q), jnp.float32)
    tok_emb = 0.05 * jax.random.normal(k2, (vocab_size, dim_q), jnp.float32)

    def qformer_fn(text_ids, query_embeds, attention_mask, encoder_hidden_states):
        img_ctx = jnp.tanh(encoder_hidden_states.mean(axis=1) @ w_img)     # [M, dim_q]
        txt_ctx = tok_emb[text_ids].mean(axis=1)                           # [M, dim_q]
        scale = attention_mask.astype(jnp.float32).mean(axis=1, keepdims=True)
        return query_embeds + (img_ctx + txt_ctx)[:, None, :] * scale[:, :, None]

    return qformer_fn


if __name__ == "__main__":
    B, Q, D = 2, 8, 32          # batch, num_query_tokens, embed_dim
    dim_q = 32                  # qformer hidden dim
    L, V = 9, 128               # seq_len, vocab_size
    P, Dv = 4, 32               # vision patches, vision dim

    key = jax.random.PRNGKey(0)
    keys = jax.random.split(key, 8)
    image_features = jax.random.normal(keys[0], (B, Q, D), jnp.float32)
    text_features = jax.random.normal(keys[1], (B, D), jnp.float32)
    image_embeddings = jax.random.normal(keys[2], (B, P, Dv), jnp.float32)
    prediction_scores = jax.random.normal(keys[3], (B, L, V), jnp.float32)

    pad_token_id, decoder_bos_token_id = 0, 1
    input_ids = jax.random.randint(keys[4], (B, L), 2, V).astype(jnp.int32)
    input_ids = input_ids.at[1, L - 2:].set(pad_token_id)      # padded tail on row 1
    attention_mask = (input_ids != pad_token_id).astype(jnp.int32)

    query_tokens = 0.02 * jax.random.normal(keys[5], (1, Q, dim_q), jnp.float32)
    blip2 = dict(
        query_tokens=query_tokens,
        qformer_fn=make_standin_qformer(keys[6], V, Dv, dim_q),
        decoder_bos_token_id=decoder_bos_token_id,
        pad_token_id=pad_token_id,
        vocab_size=V,
    )
    model_output = dict(
        image_features=image_features,
        text_features=text_features,
        image_embeddings=image_embeddings,
        prediction_scores=prediction_scores,
    )

    loss_mod = Blip2Phase1Loss(dim_q=dim_q)
    losses = loss_mod(model_output, blip2, input_ids, attention_mask, rng=keys[7])
    losses = jax.tree_util.tree_map(jax.block_until_ready, losses)
    for name in ("image_text_contrastive_loss", "image_text_matching_loss",
                 "image_captioning_loss", "total_loss"):
        assert bool(jnp.isfinite(losses[name])), name
    print("KERNEL_OK")
</pallas_src>

<mosaic_0001>
module attributes {stable_mosaic.version = 11 : i64} {
  func.func @_sim_itc_kernel(%arg0: memref<16x32xf32, #tpu.memory_space<vmem>>, %arg1: memref<2x32xf32, #tpu.memory_space<vmem>>, %arg2: memref<1x1xf32, #tpu.memory_space<smem>>, %arg3: memref<2x2xf32, #tpu.memory_space<vmem>>, %arg4: memref<2x2xf32, #tpu.memory_space<vmem>>, %arg5: memref<1x1xf32, #tpu.memory_space<vmem>>) attributes {dimension_semantics = [], scalar_prefetch = 0 : i64, scratch_operands = 0 : i64, tpu.core_type = #tpu.core_type<tc>} {
    %c0 = arith.constant 0 : index
    %c0_0 = arith.constant 0 : index
    %0 = vector.load %arg0[%c0, %c0_0] : memref<16x32xf32, #tpu.memory_space<vmem>>, vector<16x32xf32>
    %c0_1 = arith.constant 0 : index
    %c0_2 = arith.constant 0 : index
    %1 = vector.load %arg1[%c0_1, %c0_2] : memref<2x32xf32, #tpu.memory_space<vmem>>, vector<2x32xf32>
    %c0_3 = arith.constant 0 : index
    %c0_4 = arith.constant 0 : index
    %2 = memref.load %arg2[%c0_3, %c0_4] : memref<1x1xf32, #tpu.memory_space<smem>>
    %cst = arith.constant 1.000000e+00 : f32
    %3 = arith.divf %cst, %2 : f32
    %cst_5 = arith.constant dense<0.000000e+00> : vector<16x2xf32>
    %4 = tpu.matmul %0, %1, %cst_5 {dimension_numbers = #tpu.dot_dimension_numbers<[1], [1], [0], [0], [0, 0, 1, 0], [], []>} : vector<16x32xf32>, vector<2x32xf32>, vector<16x2xf32> -> vector<16x2xf32>
    %5 = vector.shape_cast %4 : vector<16x2xf32> to vector<2x8x2xf32>
    %cst_6 = arith.constant dense<0xFF800000> : vector<2x2xf32>
    %6 = vector.multi_reduction <maximumf>, %5, %cst_6 [1] : vector<2x8x2xf32> to vector<2x2xf32>
    %7 = vector.broadcast %3 : f32 to vector<2x2xf32>
    %8 = arith.mulf %6, %7 : vector<2x2xf32>
    %9 = tpu.transpose %6, [1, 0] : vector<2x2xf32> -> vector<2x2xf32>
    %10 = vector.broadcast %3 : f32 to vector<2x2xf32>
    %11 = arith.mulf %9, %10 : vector<2x2xf32>
    %c0_7 = arith.constant 0 : index
    %c0_8 = arith.constant 0 : index
    %12 = vector.load %arg3[%c0_7, %c0_8] : memref<2x2xf32, #tpu.memory_space<vmem>>, vector<2x2xf32>
    tpu.vector_store %arg3[%c0_7, %c0_8], %8 {strides = array<i32>} : memref<2x2xf32, #tpu.memory_space<vmem>>, vector<2x2xf32>,
    %c0_9 = arith.constant 0 : index
    %c0_10 = arith.constant 0 : index
    %13 = vector.load %arg4[%c0_9, %c0_10] : memref<2x2xf32, #tpu.memory_space<vmem>>, vector<2x2xf32>
    tpu.vector_store %arg4[%c0_9, %c0_10], %11 {strides = array<i32>} : memref<2x2xf32, #tpu.memory_space<vmem>>, vector<2x2xf32>,
    %cst_11 = arith.constant dense<0xFF800000> : vector<2xf32>
    %14 = vector.multi_reduction <maximumf>, %8, %cst_11 [1] : vector<2x2xf32> to vector<2xf32>
    %15 = vector.shape_cast %14 : vector<2xf32> to vector<2x1xf32>
    %16 = vector.broadcast %15 : vector<2x1xf32> to vector<2x2xf32>
    %17 = arith.subf %8, %16 : vector<2x2xf32>
    %18 = math.exp %17 : vector<2x2xf32>
    %cst_12 = arith.constant dense<0.000000e+00> : vector<2xf32>
    %19 = vector.multi_reduction <add>, %18, %cst_12 [1] : vector<2x2xf32> to vector<2xf32>
    %20 = vector.shape_cast %19 : vector<2xf32> to vector<2x1xf32>
    %21 = math.log %20 : vector<2x1xf32>
    %22 = tpu.iota {dimensions = array<i32: 1>} : vector<2x2xi32>
    %23 = tpu.iota {dimensions = array<i32: 0>} : vector<2x2xi32>
    %c0_i32 = arith.constant 0 : i32
    %24 = vector.broadcast %c0_i32 : i32 to vector<2x2xi32>
    %25 = arith.addi %23, %24 : vector<2x2xi32>
    %26 = arith.cmpi eq, %22, %25 : vector<2x2xi32>
    %cst_13 = arith.constant 0.000000e+00 : f32
    %27 = vector.broadcast %cst_13 : f32 to vector<2x2xf32>
    %28 = arith.select %26, %17, %27 : vector<2x2xi1>, vector<2x2xf32>
    %cst_14 = arith.constant dense<0.000000e+00> : vector<2xf32>
    %29 = vector.multi_reduction <add>, %28, %cst_14 [1] : vector<2x2xf32> to vector<2xf32>
    %30 = vector.shape_cast %29 : vector<2xf32> to vector<2x1xf32>
    %31 = arith.subf %21, %30 : vector<2x1xf32>
    %cst_15 = arith.constant 2.000000e+00 : f32
    %32 = vector.broadcast %cst_15 : f32 to vector<2x1xf32>
    %33 = arith.mulf %32, %21 : vector<2x1xf32>
    %cst_16 = arith.constant dense<0.000000e+00> : vector<2xf32>
    %34 = vector.multi_reduction <add>, %17, %cst_16 [1] : vector<2x2xf32> to vector<2xf32>
    %35 = vector.shape_cast %34 : vector<2xf32> to vector<2x1xf32>
    %36 = arith.subf %33, %35 : vector<2x1xf32>
    %cst_17 = arith.constant 2.000000e+00 : f32
    %37 = vector.broadcast %cst_17 : f32 to vector<2x1xf32>
    %38 = arith.divf %36, %37 : vector<2x1xf32>
    %cst_18 = arith.constant 0.899999976 : f32
    %39 = vector.broadcast %cst_18 : f32 to vector<2x1xf32>
    %40 = arith.mulf %39, %31 : vector<2x1xf32>
    %cst_19 = arith.constant 1.000000e-01 : f32
    %41 = vector.broadcast %cst_19 : f32 to vector<2x1xf32>
    %42 = arith.mulf %41, %38 : vector<2x1xf32>
    %43 = arith.addf %40, %42 : vector<2x1xf32>
    %cst_20 = arith.constant dense<0.000000e+00> : vector<1xf32>
    %44 = vector.multi_reduction <add>, %43, %cst_20 [0] : vector<2x1xf32> to vector<1xf32>
    %45 = vector.shape_cast %44 : vector<1xf32> to vector<1x1xf32>
    %cst_21 = arith.constant 2.000000e+00 : f32
    %46 = vector.broadcast %cst_21 : f32 to vector<1x1xf32>
    %47 = arith.divf %45, %46 : vector<1x1xf32>
    %cst_22 = arith.constant dense<0xFF800000> : vector<2xf32>
    %48 = vector.multi_reduction <maximumf>, %11, %cst_22 [1] : vector<2x2xf32> to vector<2xf32>
    %49 = vector.shape_cast %48 : vector<2xf32> to vector<2x1xf32>
    %50 = vector.broadcast %49 : vector<2x1xf32> to vector<2x2xf32>
    %51 = arith.subf %11, %50 : vector<2x2xf32>
    %52 = math.exp %51 : vector<2x2xf32>
    %cst_23 = arith.constant dense<0.000000e+00> : vector<2xf32>
    %53 = vector.multi_reduction <add>, %52, %cst_23 [1] : vector<2x2xf32> to vector<2xf32>
    %54 = vector.shape_cast %53 : vector<2xf32> to vector<2x1xf32>
    %55 = math.log %54 : vector<2x1xf32>
    %56 = tpu.iota {dimensions = array<i32: 1>} : vector<2x2xi32>
    %57 = tpu.iota {dimensions = array<i32: 0>} : vector<2x2xi32>
    %c0_i32_24 = arith.constant 0 : i32
    %58 = vector.broadcast %c0_i32_24 : i32 to vector<2x2xi32>
    %59 = arith.addi %57, %58 : vector<2x2xi32>
    %60 = arith.cmpi eq, %56, %59 : vector<2x2xi32>
    %cst_25 = arith.constant 0.000000e+00 : f32
    %61 = vector.broadcast %cst_25 : f32 to vector<2x2xf32>
    %62 = arith.select %60, %51, %61 : vector<2x2xi1>, vector<2x2xf32>
    %cst_26 = arith.constant dense<0.000000e+00> : vector<2xf32>
    %63 = vector.multi_reduction <add>, %62, %cst_26 [1] : vector<2x2xf32> to vector<2xf32>
    %64 = vector.shape_cast %63 : vector<2xf32> to vector<2x1xf32>
    %65 = arith.subf %55, %64 : vector<2x1xf32>
    %cst_27 = arith.constant 2.000000e+00 : f32
    %66 = vector.broadcast %cst_27 : f32 to vector<2x1xf32>
    %67 = arith.mulf %66, %55 : vector<2x1xf32>
    %cst_28 = arith.constant dense<0.000000e+00> : vector<2xf32>
    %68 = vector.multi_reduction <add>, %51, %cst_28 [1] : vector<2x2xf32> to vector<2xf32>
    %69 = vector.shape_cast %68 : vector<2xf32> to vector<2x1xf32>
    %70 = arith.subf %67, %69 : vector<2x1xf32>
    %cst_29 = arith.constant 2.000000e+00 : f32
    %71 = vector.broadcast %cst_29 : f32 to vector<2x1xf32>
    %72 = arith.divf %70, %71 : vector<2x1xf32>
    %cst_30 = arith.constant 0.899999976 : f32
    %73 = vector.broadcast %cst_30 : f32 to vector<2x1xf32>
    %74 = arith.mulf %73, %65 : vector<2x1xf32>
    %cst_31 = arith.constant 1.000000e-01 : f32
    %75 = vector.broadcast %cst_31 : f32 to vector<2x1xf32>
    %76 = arith.mulf %75, %72 : vector<2x1xf32>
    %77 = arith.addf %74, %76 : vector<2x1xf32>
    %cst_32 = arith.constant dense<0.000000e+00> : vector<1xf32>
    %78 = vector.multi_reduction <add>, %77, %cst_32 [0] : vector<2x1xf32> to vector<1xf32>
    %79 = vector.shape_cast %78 : vector<1xf32> to vector<1x1xf32>
    %cst_33 = arith.constant 2.000000e+00 : f32
    %80 = vector.broadcast %cst_33 : f32 to vector<1x1xf32>
    %81 = arith.divf %79, %80 : vector<1x1xf32>
    %82 = arith.addf %47, %81 : vector<1x1xf32>
    %cst_34 = arith.constant 5.000000e-01 : f32
    %83 = vector.broadcast %cst_34 : f32 to vector<1x1xf32>
    %84 = arith.mulf %83, %82 : vector<1x1xf32>
    %c0_35 = arith.constant 0 : index
    %c0_36 = arith.constant 0 : index
    %85 = vector.load %arg5[%c0_35, %c0_36] : memref<1x1xf32, #tpu.memory_space<vmem>>, vector<1x1xf32>
    tpu.vector_store %arg5[%c0_35, %c0_36], %84 {strides = array<i32>} : memref<1x1xf32, #tpu.memory_space<vmem>>, vector<1x1xf32>,
    return
  }
}

</mosaic_0001>

<bundles_post_ra>
// kernel: tpu_custom_call.1
= control target key start
LH: loop header
LB: loop body
LE: loop exit
PB: predicated region body
PF: predicated region fallthrough
CT: control target
= control target key end

     0   :  { %12 = vsyncpa [#allocation4], 0  ;;  %s499_s0 = inlined_call_operand.hbm [shape: f32[16,32], index: 0, kind: input, shape index: {}]   ;;  %s500_s1 = inlined_call_operand.vmem [shape: f32[2,32], index: 1, kind: input, shape index: {}]   ;;  %s501_s2 = inlined_call_operand.<no memory space> [shape: f32[1,1], index: 2, kind: input, shape index: {}]   ;;  %s502_s3 = inlined_call_operand.hbm [shape: f32[2,2], index: 3, kind: output, shape index: {0}]   ;;  %s503_s4 = inlined_call_operand.hbm [shape: f32[2,2], index: 4, kind: output, shape index: {1}]   ;;  %s504_s5 = inlined_call_operand.hbm [shape: f32[1,1], index: 5, kind: output, shape index: {2}]  }
   0x1   :  { %13 = vsyncpa [#allocation5], 0 }
   0x2   :  { %14 = vsyncpa [#allocation8], 0  ;;  %s19_s20 = sshll.u32 %s499_s0, 4  ;;  %s430_s21 = smov [#allocation3]   ;;  %s20_s20 = int_to_ptr.hbm [resolvable:$true] %s19_s20 }
   0x3   :  { %s21_s22 = sshll.u32 %s430_s21, 4  ;;  %s431_s23 = smov 128   ;;  %s22_s22 = int_to_ptr.vmem [resolvable:$true] %s21_s22 }
   0x4   :  { %s432_s24 = smov 8  }
   0x5   :  { %27 = dma.hbm_to_vmem [thread:$0]  %s20_s20, 256, %s22_s22, [#allocation4], %s431_s23, %s431_s23, %s432_s24  }
   0x6   :  { %424 = dma.done.wait [#allocation4], 256  }
   0x7   :  { %425 = vsyncadd [#allocation4], 4294967040  ;;  %v40_v0 = vstv %s501_s2  ;;  %vm56_vm0 = vcmask 261120   ;;  %v38_v2 = vld [vmem:[%s500_s1] sm:$0x3]  ;;  %v37_v4 = vld [vmem:[#allocation3 + $0x8] sm:$0xff]  ;;  %v175_v52 = vlaneseq }
   0x8   :  { %314 = vrcp.f32 %v40_v0  ;;  %300 = vmatpush.xpose.msk.msra.mxu0 %vm56_vm0, %v38_v2  ;;  %303 = vmatpush.xpose.msk.msra.mxu1 %vm56_vm0, %v38_v2  ;;  %v36_v3 = vld [vmem:[#allocation3] sm:$0xff]  ;;  %v52_v6 = vand.u32 2147483648, %v40_v0  ;;  %vm46_vm1 = vweird.f32 %v40_v0  ;;  %v50_v8 = vand.u32 2147483647, %v40_v0  ;;  %s270_s29 = sshll.u32 %s503_s4, 4  ;;  %s433_s30 = smov [#allocation7]   ;;  %s271_s29 = int_to_ptr.hbm [resolvable:$true] %s270_s29 }
   0x9   :  { %vm89_vm5 = vcmask 15360   ;;  %vm109_vm6 = vcmask 1041409   ;;  %vm149_vm7 = vcmask 9216   ;;  %v176_v57 = vand.u32 127, %v175_v52  ;;  %s268_s6 = sshll.u32 %s433_s30, 4  ;;  %s434_s7 = smov [#allocation6]   ;;  %s269_s6 = int_to_ptr.vmem [resolvable:$true] %s268_s6 }
   0xa   :  { %v53_v10 = vor.u32 1.1754944e-38, %v52_v6  ;;  %vm51_vm4 = vcmp.eq.f32.partialorder %v50_v8, 8.507059e+37  ;;  %v178_v58 = vshrl.u32 %v175_v52, 7  ;;  %s257_s8 = sshll.u32 %s434_s7, 4  ;;  %s259_s11 = sshll.u32 %s502_s3, 4  ;;  %v435_v2 = vmov 2.0   ;;  %s258_s8 = int_to_ptr.vmem [resolvable:$true] %s257_s8  ;;  %s260_s11 = int_to_ptr.hbm [resolvable:$true] %s259_s11 }
   0xb   :  { %301 = vmatmul.msk.f32.vlgmr.msra.gmra.mxu0 %vm56_vm0, %v36_v3  ;;  %302 = vmatmul.msk.f32.vlgmr.msra.gmra.mxu1 %vm56_vm0, %v37_v4  ;;  %vm206_vm10 = vcmask 1041408   ;;  %s436_s3 = smov [#allocation9]   ;;  %s281_s14 = sshll.u32 %s504_s5, 4  ;;  %vm250_vm11 = vcmask 0   ;;  %s282_s14 = int_to_ptr.hbm [resolvable:$true] %s281_s14 }
   0xc   :  { %vm179_vm8 = vcmp.eq.s32.totalorder %v176_v57, %v178_v58  ;;  %s279_s4 = sshll.u32 %s436_s3, 4  ;;  %s280_s4 = int_to_ptr.vmem [resolvable:$true] %s279_s4 }
   0xe   :  { %v315_v1 = vpop.eup %314 }
   0xf   :  { %v42_v5 = vmul.f32 %v315_v1, %v40_v0  ;;  %vm47_vm2 = vweird.f32 %v315_v1 }
  0x10   :  { %vm48_vm3 = vmor %vm46_vm1, %vm47_vm2 }
  0x11   :  { %v43_v7 = vsub.f32 1.0, %v42_v5 }
  0x13   :  { %v44_v9 = vmul.f32 %v315_v1, %v43_v7 }
  0x15   :  { %v45_v11 = vadd.f32 %v315_v1, %v44_v9 }
  0x17   :  { %v49_v12 = vsel %vm48_vm3, %v315_v1, %v45_v11 }
  0x18   :  { %v54_v13 = vsel %vm51_vm4, %v53_v10, %v49_v12 }
  0x19   :  { %304 = vpush %v54_v13 }
  0x4a   :  { %s305_s0 = spop %304 }
  0x4b   :  { %v104_v28 = vstv %s305_s0 }
  0x88   :  { %v83_v14 = vpop.f32.mrf.mxu0  ;;  %v86_v15 = vpop.f32.mrf.mxu1 }
  0x89   :  { %v90_v16 = vsel %vm89_vm5, %v83_v14, -inf  ;;  %v97_v17 = vsel %vm89_vm5, %v86_v15, -inf }
  0x8a   :  { %v91_v18 = vrot.slane %v90_v16, 4  ;;  %v98_v19 = vrot.slane %v97_v17, 4 }
  0x8c   :  { %v92_v20 = vmax.f32 %v90_v16, %v91_v18  ;;  %v99_v21 = vmax.f32 %v97_v17, %v98_v19 }
  0x8e   :  { %v93_v22 = vrot.slane %v92_v20, 2  ;;  %v100_v23 = vrot.slane %v99_v21, 2 }
  0x90   :  { %v94_v24 = vmax.f32 %v92_v20, %v93_v22  ;;  %v101_v25 = vmax.f32 %v99_v21, %v100_v23 }
  0x92   :  { %v95_v26 = vrot.slane %v94_v24, 1  ;;  %v102_v27 = vrot.slane %v101_v25, 1 }
  0x94   :  { %v96_v29 = vmax.f32 %v94_v24, %v95_v26  ;;  %v103_v30 = vmax.f32 %v101_v25, %v102_v27 }
  0x96   :  { %v105_v31 = vmul.f32 %v104_v28, %v96_v29  ;;  %v106_v32 = vmul.f32 %v104_v28, %v103_v30  ;;  %v110_v33 = vsel %vm109_vm6, %v103_v30, %v96_v29 }
  0x97   :  { %112 = vxpose.xlu0.b32.start.end [1/1] (short) (narrow) %v110_v33, 8 }
  0x98   :  { %v147_v34 = vsel %vm109_vm6, %v106_v32, %v105_v31 }
  0x99   :  { %150 = vst.msk [vmem:[#allocation6] sm:$0x3] %vm149_vm7, %v147_v34  ;;  %v152_v35 = vsel %vm149_vm7, %v147_v34, -inf }
  0x9a   :  { %262 = dma.vmem_to_hbm [thread:$0]  %s258_s8, 32, %s260_s11, [#allocation5]  }
 0x108   :  { %153 = vmax.xlane.f32.xlu0 %v152_v35 }
 0x13b   :  { %v128_v36 = vpop.trf.xlu0 }
 0x13c   :  { %v144_v37 = vmul.f32 %v128_v36, %v104_v28 }
 0x13e   :  { %151 = vst.msk [vmem:[#allocation7] sm:$0x3] %vm149_vm7, %v144_v37  ;;  %v215_v38 = vsel %vm149_vm7, %v144_v37, -inf }
 0x13f   :  { %216 = vmax.xlane.f32.xlu1 %v215_v38  ;;  %273 = dma.vmem_to_hbm [thread:$0]  %s269_s6, 32, %s271_s29, [#allocation8]  }
 0x17b   :  { %v154_v39 = vpop.xlane.xlu0 %153 }
 0x17c   :  { %v156_v40 = vrot.slane %v154_v39, 1  ;;  %v159_v41 = vsub.f32 %v105_v31, %v154_v39 }
 0x17e   :  { %v160_v42 = vsub.f32 %v106_v32, %v156_v40  ;;  %v161_v43 = vmul.f32 1.442695, %v159_v41 }
 0x180   :  { %v163_v44 = vmul.f32 1.442695, %v160_v42  ;;  %v182_v45 = vrot.slane %v160_v42, 7 }
 0x182   :  { %316 = vpow2.f32 %v163_v44  ;;  %v183_v46 = vsel %vm109_vm6, %v182_v45, %v159_v41 }
 0x183   :  { %318 = vpow2.f32 %v161_v43  ;;  %v191_v63 = vsel %vm149_vm7, %v183_v46, 0.0  ;;  %v185_v0 = vsel %vm179_vm8, %v183_v46, 0.0 }
 0x184   :  { %v186_v1 = vsel %vm149_vm7, %v185_v0, 0.0 }
 0x188   :  { %v317_v47 = vpop.eup %316 }
 0x189   :  { %v167_v48 = vrot.slane %v317_v47, 7  ;;  %v319_v49 = vpop.eup %318 }
 0x18b   :  { %v168_v50 = vsel %vm109_vm6, %v167_v48, %v319_v49 }
 0x18c   :  { %v170_v51 = vsel %vm149_vm7, %v168_v50, 0.0 }
 0x18d   :  { %171 = vadd.xlane.f32.xlu1 %v170_v51 }
 0x1b2   :  { %v217_v53 = vpop.xlane.xlu1 %216 }
 0x1b3   :  { %v218_v54 = vsub.f32 %v144_v37, %v217_v53 }
 0x1b5   :  { %v219_v55 = vmul.f32 1.442695, %v218_v54  ;;  %v232_v56 = vsel %vm149_vm7, %v218_v54, 0.0  ;;  %v226_v59 = vsel %vm179_vm8, %v218_v54, 0.0 }
 0x1b6   :  { %233 = vadd.xlane.f32.xlu1 %v232_v56  ;;  %v227_v61 = vsel %vm149_vm7, %v226_v59, 0.0 }
 0x1b7   :  { %320 = vpow2.f32 %v219_v55 }
 0x1b8   :  { %322 = vrcp.f32 %v435_v2 }
 0x1bd   :  { %v321_v60 = vpop.eup %320 }
 0x1be   :  { %228 = vadd.xlane.f32.xlu1 %v227_v61  ;;  %v221_v62 = vsel %vm149_vm7, %v321_v60, 0.0  ;;  %v323_v3 = vpop.eup %322 }
 0x1bf   :  { %222 = vadd.xlane.f32.xlu2 %v221_v62  ;;  %v196_v5 = vmul.f32 2.0, %v323_v3  ;;  %vm200_vm9 = vweird.f32 %v323_v3 }
 0x1c1   :  { %v197_v7 = vsub.f32 1.0, %v196_v5 }
 0x1c3   :  { %v198_v10 = vmul.f32 %v323_v3, %v197_v7 }
 0x1c5   :  { %v199_v14 = vadd.f32 %v323_v3, %v198_v10 }
 0x1c7   :  { %192 = vadd.xlane.f32.xlu2 %v191_v63  ;;  %v201_v22 = vsel %vm200_vm9, %v323_v3, %v199_v14 }
 0x1cf   :  { %187 = vadd.xlane.f32.xlu2 %v186_v1 }
 0x200   :  { %v172_v4 = vpop.xlane.xlu1 %171 }
 0x201   :  { %324 = vlog2.f32 %v172_v4 }
 0x207   :  { %v325_v9 = vpop.eup %324 }
 0x208   :  { %v174_v11 = vmul.f32 0.6931472, %v325_v9 }
 0x20a   :  { %v190_v16 = vmul.f32 2.0, %v174_v11 }
 0x229   :  { %v234_v8 = vpop.xlane.xlu1 %233 }
 0x231   :  { %v229_v18 = vpop.xlane.xlu1 %228 }
 0x232   :  { %v223_v6 = vpop.xlane.xlu2 %222 }
 0x233   :  { %326 = vlog2.f32 %v223_v6 }
 0x239   :  { %v327_v12 = vpop.eup %326 }
 0x23a   :  { %v225_v13 = vmul.f32 0.6931472, %v327_v12  ;;  %v193_v15 = vpop.xlane.xlu2 %192 }
 0x23b   :  { %v194_v19 = vsub.f32 %v190_v16, %v193_v15 }
 0x23c   :  { %v231_v17 = vmul.f32 2.0, %v225_v13  ;;  %v230_v20 = vsub.f32 %v225_v13, %v229_v18 }
 0x23d   :  { %v202_v24 = vmul.f32 %v201_v22, %v194_v19 }
 0x23e   :  { %v235_v21 = vsub.f32 %v231_v17, %v234_v8  ;;  %v237_v25 = vmul.f32 0.9, %v230_v20 }
 0x23f   :  { %v204_v30 = vmul.f32 0.1, %v202_v24 }
 0x240   :  { %v236_v23 = vmul.f32 %v235_v21, %v201_v22 }
 0x242   :  { %v238_v26 = vmul.f32 0.1, %v236_v23  ;;  %v188_v27 = vpop.xlane.xlu2 %187 }
 0x243   :  { %v189_v28 = vsub.f32 %v174_v11, %v188_v27 }
 0x244   :  { %v239_v29 = vadd.f32 %v238_v26, %v237_v25 }
 0x245   :  { %v203_v31 = vmul.f32 0.9, %v189_v28 }
 0x246   :  { %v240_v32 = vsel %vm206_vm10, %v239_v29, 0.0 }
 0x247   :  { %v205_v33 = vadd.f32 %v204_v30, %v203_v31  ;;  %v241_v34 = vrot.slane %v240_v32, 4 }
 0x249   :  { %v207_v35 = vsel %vm206_vm10, %v205_v33, 0.0  ;;  %v242_v36 = vadd.f32 %v241_v34, %v240_v32 }
 0x24a   :  { %v208_v37 = vrot.slane %v207_v35, 4 }
 0x24b   :  { %v243_v38 = vrot.slane %v242_v36, 2 }
 0x24c   :  { %v209_v39 = vadd.f32 %v208_v37, %v207_v35 }
 0x24d   :  { %v244_v40 = vadd.f32 %v243_v38, %v242_v36 }
 0x24e   :  { %v210_v41 = vrot.slane %v209_v39, 2 }
 0x24f   :  { %v245_v42 = vrot.slane %v244_v40, 1 }
 0x250   :  { %v211_v43 = vadd.f32 %v210_v41, %v209_v39 }
 0x251   :  { %v246_v45 = vadd.f32 %v245_v42, %v244_v40 }
 0x252   :  { %v212_v44 = vrot.slane %v211_v43, 1 }
 0x253   :  { %v247_v48 = vmul.f32 %v246_v45, %v201_v22 }
 0x254   :  { %v213_v46 = vadd.f32 %v212_v44, %v211_v43 }
 0x256   :  { %v214_v47 = vmul.f32 %v213_v46, %v201_v22 }
 0x258   :  { %v248_v49 = vadd.f32 %v247_v48, %v214_v47 }
 0x25a   :  { %v249_v50 = vmul.f32 0.5, %v248_v49 }
 0x25c   :  { %251 = vst.msk [vmem:[#allocation9] sm:$0x1] %vm250_vm11, %v249_v50 }
 0x25d   :  { %284 = dma.vmem_to_hbm [thread:$0]  %s280_s4, 16, %s282_s14, [#allocation8]  }
 0x25e   :  { %426 = dma.done.wait [#allocation5], 32  }
 0x25f   :  { %427 = vsyncadd [#allocation5], 4294967264 }
 0x260   :  { %428 = dma.done.wait [#allocation8], 48  }
 0x261   :  { %429 = vsyncadd [#allocation8], 4294967248 }
 0x262   :  { %297 = vsyncpa [#allocation4], 1 }
 0x263   :  { %298 = vsyncpa [#allocation5], 1 }
 0x264   :  { %299 = vsyncpa [#allocation8], 1 }

</bundles_post_ra>
